<compile_context>
chip_gen: v6e
topology: v6e:2x2x1
jax: 0.10.0
libtpu: 0.0.40
codegen_flags: <defaults>
</compile_context>

<pallas_src>
import functools

import jax
import jax.numpy as jnp
from jax.experimental import pallas as pl
from jax.experimental.pallas import tpu as pltpu

LANES = 128
MAX_BLOCK_ROWS = 2048      # 2048 * 128 * 4 B = 1 MiB per f32 input block
NUM_SLABS = 2              # per-core accumulator slabs (v7x megacore); harmless elsewhere


def _make_sums_kernel(block_rows, rows_per_slab, steps_per_slab):
    """Builds the reduction kernel for a fixed (static) tiling."""
    ragged = (rows_per_slab % block_rows) != 0
    valid_rows_last = rows_per_slab - (steps_per_slab - 1) * block_rows

    def kernel(x_ref, y_ref, out_ref):
        step = pl.program_id(1)

        # Output slab is resident across the sequential axis -> accumulator.
        @pl.when(step == 0)
        def _init():
            out_ref[...] = jnp.zeros_like(out_ref)

        x = x_ref[...].astype(jnp.float32)
        y = y_ref[...].astype(jnp.float32)

        def accumulate(xv, yv):
            d = xv - yv
            partial = jnp.concatenate(
                [
                    jnp.sum(jnp.abs(d), axis=0, keepdims=True),   # sum |x - y|
                    jnp.sum(xv, axis=0, keepdims=True),           # sum x
                    jnp.sum(yv, axis=0, keepdims=True),           # sum y
                    jnp.sum(xv * yv, axis=0, keepdims=True),      # sum x*y
                    jnp.sum(xv * xv, axis=0, keepdims=True),      # sum x^2
                    jnp.sum(yv * yv, axis=0, keepdims=True),      # sum y^2
                    jnp.zeros((2, LANES), jnp.float32),           # unused rows
                ],
                axis=0,
            )  # (8, LANES): a single full-tile RMW into the resident slab.
            out_ref[...] += partial

        if ragged:
            # Only the last block of a slab contains out-of-bounds (garbage)
            # rows; mask them there, keep the hot path mask-free.
            is_last = step == steps_per_slab - 1

            @pl.when(is_last)
            def _masked():
                rid = jax.lax.broadcasted_iota(jnp.int32, (block_rows, LANES), 0)
                valid = rid < valid_rows_last
                accumulate(jnp.where(valid, x, 0.0), jnp.where(valid, y, 0.0))

            @pl.when(jnp.logical_not(is_last))
            def _full():
                accumulate(x, y)
        else:
            accumulate(x, y)

    return kernel


def _reduction_sums(predictions, targets):
    """Returns (sums[6+2], n) where sums = [sum|x-y|, sum x, sum y, sum xy, sum x^2, sum y^2, 0, 0]."""
    assert predictions.shape == targets.shape, (predictions.shape, targets.shape)
    n = predictions.size
    xf = predictions.reshape(-1)          # native dtype, no HBM cast pass
    yf = targets.reshape(-1)

    # Minimal lane padding only (< 128 zeros); zeros contribute 0 to all sums.
    lane_pad = (-n) % LANES
    if lane_pad:
        xf = jnp.pad(xf, (0, lane_pad))
        yf = jnp.pad(yf, (0, lane_pad))
    rows = (n + lane_pad) // LANES

    # Native sublane tile for this dtype: 8 (f32), 16 (bf16), 32 (int8/fp8).
    itemsize = jnp.dtype(predictions.dtype).itemsize
    sub = 8 * max(1, 4 // max(1, itemsize))

    # Split rows into per-core slabs when it divides cleanly, else single slab.
    if rows % NUM_SLABS == 0 and (rows // NUM_SLABS) >= sub:
        num_slabs = NUM_SLABS
    else:
        num_slabs = 1
    rows_per_slab = rows // num_slabs

    if rows_per_slab >= sub:
        block_rows = min(MAX_BLOCK_ROWS, (rows_per_slab // sub) * sub)
    else:
        block_rows = rows_per_slab        # full (sub-tile-sized) dimension
    steps_per_slab = pl.cdiv(rows_per_slab, block_rows)

    x3 = xf.reshape(num_slabs, rows_per_slab, LANES)
    y3 = yf.reshape(num_slabs, rows_per_slab, LANES)

    kernel = _make_sums_kernel(block_rows, rows_per_slab, steps_per_slab)

    # Explicit VMEM sizing: 2 inputs x 2 pipeline buffers x block + outputs + slack.
    block_bytes = block_rows * LANES * itemsize
    vmem_bytes = 4 * block_bytes + num_slabs * 8 * LANES * 4 + (2 << 20)
    vmem_limit = int(min(max(vmem_bytes, 16 << 20), 32 << 20))

    sums = pl.pallas_call(
        kernel,
        out_shape=jax.ShapeDtypeStruct((num_slabs, 8, LANES), jnp.float32),
        grid_spec=pltpu.PrefetchScalarGridSpec(
            num_scalar_prefetch=0,
            grid=(num_slabs, steps_per_slab),
            in_specs=[
                pl.BlockSpec((None, block_rows, LANES), lambda p, i: (p, i, 0)),
                pl.BlockSpec((None, block_rows, LANES), lambda p, i: (p, i, 0)),
            ],
            out_specs=pl.BlockSpec((None, 8, LANES), lambda p, i: (p, 0, 0)),
        ),
        compiler_params=pltpu.CompilerParams(
            dimension_semantics=("parallel", "arbitrary"),
            vmem_limit_bytes=vmem_limit,
        ),
    )(x3, y3)

    # Tiny finalize: fold per-core slabs and lanes.
    return jnp.sum(sums, axis=(0, 2)), n


def combined_l1_pearson_loss(predictions, targets, alpha=0.5):
    s, n = _reduction_sums(predictions, targets)
    nf = jnp.float32(n)

    sabs, sx, sy, sxy, sxx, syy = s[0], s[1], s[2], s[3], s[4], s[5]

    # L1 (mean reduction).
    l1 = sabs / nf

    # Pearson via one-pass sums; clamp variances to avoid NaN from f32
    # cancellation when the data mean is large relative to its spread.
    mx = sx / nf
    my = sy / nf
    cov = sxy - nf * mx * my                      # sum(vx * vy)
    var_x = jnp.maximum(sxx - nf * mx * mx, 0.0)  # sum(vx ** 2)
    var_y = jnp.maximum(syy - nf * my * my, 0.0)  # sum(vy ** 2)
    cost = cov / (jnp.sqrt(var_x) * jnp.sqrt(var_y))
    pearson = 1.0 - cost

    return alpha * l1 + (1.0 - alpha) * pearson


def _reference_loss(predictions, targets, alpha=0.5):
    x = predictions.reshape(-1).astype(jnp.float32)
    y = targets.reshape(-1).astype(jnp.float32)
    l1 = jnp.mean(jnp.abs(x - y))
    vx = x - jnp.mean(x)
    vy = y - jnp.mean(y)
    cost = jnp.sum(vx * vy) / (jnp.sqrt(jnp.sum(vx ** 2)) * jnp.sqrt(jnp.sum(vy ** 2)))
    pearson = 1.0 - cost
    return alpha * l1 + (1.0 - alpha) * pearson


if __name__ == "__main__":
    key = jax.random.PRNGKey(0)
    k1, k2 = jax.random.split(key)
    shape = (2, 4, 16, 16)  # NCHW
    predictions = jax.random.normal(k1, shape, dtype=jnp.float32)
    targets = jax.random.normal(k2, shape, dtype=jnp.float32)

    loss_fn = jax.jit(functools.partial(combined_l1_pearson_loss, alpha=0.5))
    loss = jax.block_until_ready(loss_fn(predictions, targets))

    ref = jax.block_until_ready(_reference_loss(predictions, targets, alpha=0.5))
    assert jnp.allclose(loss, ref, rtol=1e-5, atol=1e-5), (loss, ref)

    print("KERNEL_OK")
</pallas_src>

<mosaic_0001>
module attributes {stable_mosaic.version = 11 : i64} {
  func.func @kernel(%arg0: i32, %arg1: i32, %arg2: memref<1x8x128xf32, #tpu.memory_space<vmem>>, %arg3: memref<1x8x128xf32, #tpu.memory_space<vmem>>, %arg4: memref<1x8x128xf32, #tpu.memory_space<vmem>>) attributes {dimension_semantics = [#tpu.dimension_semantics<parallel>, #tpu.dimension_semantics<arbitrary>], iteration_bounds = array<i64: 2, 1>, scalar_prefetch = 0 : i64, scratch_operands = 0 : i64, tpu.core_type = #tpu.core_type<tc>, window_params = [{transform_indices = @transform_0, window_bounds = array<i64: 1, 8, 128>}, {transform_indices = @transform_1, window_bounds = array<i64: 1, 8, 128>}, {transform_indices = @transform_2, window_bounds = array<i64: 1, 8, 128>}]} {
    %c0_i32 = arith.constant 0 : i32
    %0 = arith.cmpi eq, %arg1, %c0_i32 : i32
    %1 = arith.extui %0 : i1 to i32
    %c0_i32_0 = arith.constant 0 : i32
    %2 = arith.cmpi ne, %1, %c0_i32_0 : i32
    scf.if %2 {
      %cst_18 = arith.constant 0.000000e+00 : f32
      %32 = vector.broadcast %cst_18 : f32 to vector<8x128xf32>
      %c0_19 = arith.constant 0 : index
      %c0_20 = arith.constant 0 : index
      %c0_21 = arith.constant 0 : index
      %33 = vector.load %arg4[%c0_19, %c0_20, %c0_21] : memref<1x8x128xf32, #tpu.memory_space<vmem>>, vector<1x8x128xf32>
      %34 = vector.shape_cast %33 : vector<1x8x128xf32> to vector<8x128xf32>
      %35 = vector.shape_cast %32 : vector<8x128xf32> to vector<1x8x128xf32>
      tpu.vector_store %arg4[%c0_19, %c0_20, %c0_21], %35 {strides = array<i32>} : memref<1x8x128xf32, #tpu.memory_space<vmem>>, vector<1x8x128xf32>,
    } else {
    }
    %c0 = arith.constant 0 : index
    %c0_1 = arith.constant 0 : index
    %c0_2 = arith.constant 0 : index
    %3 = vector.load %arg2[%c0, %c0_1, %c0_2] : memref<1x8x128xf32, #tpu.memory_space<vmem>>, vector<1x8x128xf32>
    %4 = vector.shape_cast %3 : vector<1x8x128xf32> to vector<8x128xf32>
    %c0_3 = arith.constant 0 : index
    %c0_4 = arith.constant 0 : index
    %c0_5 = arith.constant 0 : index
    %5 = vector.load %arg3[%c0_3, %c0_4, %c0_5] : memref<1x8x128xf32, #tpu.memory_space<vmem>>, vector<1x8x128xf32>
    %6 = vector.shape_cast %5 : vector<1x8x128xf32> to vector<8x128xf32>
    %7 = arith.subf %4, %6 : vector<8x128xf32>
    %8 = math.absf %7 : vector<8x128xf32>
    %cst = arith.constant dense<0.000000e+00> : vector<128xf32>
    %9 = vector.multi_reduction <add>, %8, %cst [0] : vector<8x128xf32> to vector<128xf32>
    %10 = vector.shape_cast %9 : vector<128xf32> to vector<1x128xf32>
    %cst_6 = arith.constant dense<0.000000e+00> : vector<128xf32>
    %11 = vector.multi_reduction <add>, %4, %cst_6 [0] : vector<8x128xf32> to vector<128xf32>
    %12 = vector.shape_cast %11 : vector<128xf32> to vector<1x128xf32>
    %cst_7 = arith.constant dense<0.000000e+00> : vector<128xf32>
    %13 = vector.multi_reduction <add>, %6, %cst_7 [0] : vector<8x128xf32> to vector<128xf32>
    %14 = vector.shape_cast %13 : vector<128xf32> to vector<1x128xf32>
    %15 = arith.mulf %4, %6 : vector<8x128xf32>
    %cst_8 = arith.constant dense<0.000000e+00> : vector<128xf32>
    %16 = vector.multi_reduction <add>, %15, %cst_8 [0] : vector<8x128xf32> to vector<128xf32>
    %17 = vector.shape_cast %16 : vector<128xf32> to vector<1x128xf32>
    %18 = arith.mulf %4, %4 : vector<8x128xf32>
    %cst_9 = arith.constant dense<0.000000e+00> : vector<128xf32>
    %19 = vector.multi_reduction <add>, %18, %cst_9 [0] : vector<8x128xf32> to vector<128xf32>
    %20 = vector.shape_cast %19 : vector<128xf32> to vector<1x128xf32>
    %21 = arith.mulf %6, %6 : vector<8x128xf32>
    %cst_10 = arith.constant dense<0.000000e+00> : vector<128xf32>
    %22 = vector.multi_reduction <add>, %21, %cst_10 [0] : vector<8x128xf32> to vector<128xf32>
    %23 = vector.shape_cast %22 : vector<128xf32> to vector<1x128xf32>
    %cst_11 = arith.constant 0.000000e+00 : f32
    %24 = vector.broadcast %cst_11 : f32 to vector<2x128xf32>
    %25 = tpu.concatenate %10, %12, %14, %17, %20, %23, %24 in 0 : vector<1x128xf32>, vector<1x128xf32>, vector<1x128xf32>, vector<1x128xf32>, vector<1x128xf32>, vector<1x128xf32>, vector<2x128xf32> -> vector<8x128xf32>
    %c0_12 = arith.constant 0 : index
    %c0_13 = arith.constant 0 : index
    %c0_14 = arith.constant 0 : index
    %26 = vector.load %arg4[%c0_12, %c0_13, %c0_14] : memref<1x8x128xf32, #tpu.memory_space<vmem>>, vector<1x8x128xf32>
    %27 = vector.shape_cast %26 : vector<1x8x128xf32> to vector<8x128xf32>
    %28 = arith.addf %27, %25 : vector<8x128xf32>
    %c0_15 = arith.constant 0 : index
    %c0_16 = arith.constant 0 : index
    %c0_17 = arith.constant 0 : index
    %29 = vector.load %arg4[%c0_15, %c0_16, %c0_17] : memref<1x8x128xf32, #tpu.memory_space<vmem>>, vector<1x8x128xf32>
    %30 = vector.shape_cast %29 : vector<1x8x128xf32> to vector<8x128xf32>
    %31 = vector.shape_cast %28 : vector<8x128xf32> to vector<1x8x128xf32>
    tpu.vector_store %arg4[%c0_15, %c0_16, %c0_17], %31 {strides = array<i32>} : memref<1x8x128xf32, #tpu.memory_space<vmem>>, vector<1x8x128xf32>,
    return
  }
  func.func @transform_0(%arg0: i32, %arg1: i32) -> (i32, i32, i32) {
    %c0_i32 = arith.constant 0 : i32
    %c0_i32_0 = arith.constant 0 : i32
    return %arg0, %arg1, %c0_i32 : i32, i32, i32
  }
  func.func @transform_1(%arg0: i32, %arg1: i32) -> (i32, i32, i32) {
    %c0_i32 = arith.constant 0 : i32
    %c0_i32_0 = arith.constant 0 : i32
    return %arg0, %arg1, %c0_i32 : i32, i32, i32
  }
  func.func @transform_2(%arg0: i32, %arg1: i32) -> (i32, i32, i32) {
    %c0_i32 = arith.constant 0 : i32
    %c0_i32_0 = arith.constant 0 : i32
    %c0_i32_1 = arith.constant 0 : i32
    return %arg0, %c0_i32, %c0_i32_0 : i32, i32, i32
  }
}

</mosaic_0001>

<bundles_post_ra>
// kernel: combined_l1_pearson_loss.1
= control target key start
LH: loop header
LB: loop body
LE: loop exit
PB: predicated region body
PF: predicated region fallthrough
CT: control target
= control target key end

     0   :  { %s406_s9 = smov 0   ;;  %s408_s10 = smov 0   ;;  %s447_s0 = inlined_call_operand.vmem [shape: f32[2,8,128], index: 0, kind: input, shape index: {}]   ;;  %s448_s1 = inlined_call_operand.vmem [shape: f32[2,8,128], index: 1, kind: input, shape index: {}]   ;;  %s449_s2 = inlined_call_operand.vmem [shape: f32[2,8,128], index: 2, kind: output, shape index: {}]  }
   0x1   :  { %s410_s11 = smov 0  }
   0x2 LB: > { %s24_s12 = sadd.s32 1, %s385_s10  ;;  %p336_p0 = scmp.ge.s32.totalorder %s389_s11, 1  ;;  %s389_s11 = sphi %s410_s11, %s12_s11   ;;  %s385_s10 = sphi %s408_s10, %s451_s10   ;;  %s381_s9 = sphi %s406_s9, %s450_s9  }
   0x3   : > { %p26_p1 = scmp.ge.s32.totalorder %s24_s12, 2  ;;  %p142_p2 = scmp.lt.s32.totalorder %s389_s11, 3 }
   0x5   : > { %s453_s12 = smov (%p26_p1, %s24_s12), 0  ;;  %p143_p3 = pnand %p336_p0, %p142_p2 }
   0x6   : > { %p172_p4 = scmp.lt.s32.totalorder (!%p143_p3), %s381_s9, 1 }
   0x7   : > { %146 = sbr.rel (%p143_p3) target bundleno = 40 (0x28), region = 28 }
   0xc   : > { %s455_s9 = smov (!%p172_p4, %s381_s9), 1  ;;  %vm238_vm0 = vcmask 1040384   ;;  %vm240_vm1 = vcmask 1041408   ;;  %vm242_vm2 = vcmask 1042432   ;;  %vm244_vm3 = vcmask 1043456  }
   0xd   : > { %s424_s13 = sshll.u32 %s455_s9, 3  ;;  %vm246_vm4 = vcmask 1044480   ;;  %vm248_vm5 = vcmask 1045504  }
   0xe   : > { %s178_s16 = scalar_lea.vmem %s447_s0, %s424_s13  ;;  %s185_s19 = scalar_lea.vmem %s448_s1, %s424_s13 }
   0xf   : > { %v195_v0 = vld [vmem:[%s178_s16] sm:$0xff]  ;;  %s189_s22 = scalar_lea.vmem %s449_s2, %s424_s13 }
  0x10   : > { %v196_v1 = vld [vmem:[%s185_s19] sm:$0xff]  ;;  %v205_v3 = vrot.slane %v195_v0, 4  ;;  %v224_v6 = vmul.f32 %v195_v0, %v195_v0 }
  0x11   : > { %v197_v2 = vsub.f32 %v195_v0, %v196_v1  ;;  %v211_v4 = vrot.slane %v196_v1, 4  ;;  %v217_v5 = vmul.f32 %v196_v1, %v195_v0  ;;  %v231_v7 = vmul.f32 %v196_v1, %v196_v1 }
  0x12   : > { %v206_v9 = vadd.f32 %v205_v3, %v195_v0  ;;  %v225_v12 = vrot.slane %v224_v6, 4 }
  0x13   : > { %v198_v8 = vand.u32 2147483647, %v197_v2  ;;  %v212_v10 = vadd.f32 %v211_v4, %v196_v1  ;;  %v218_v11 = vrot.slane %v217_v5, 4  ;;  %v232_v13 = vrot.slane %v231_v7, 4 }
  0x14   : > { %v207_v15 = vrot.slane %v206_v9, 2  ;;  %v226_v18 = vadd.f32 %v225_v12, %v224_v6 }
  0x15   : > { %v199_v14 = vrot.slane %v198_v8, 4  ;;  %v213_v16 = vrot.slane %v212_v10, 2  ;;  %v219_v17 = vadd.f32 %v218_v11, %v217_v5  ;;  %v233_v19 = vadd.f32 %v232_v13, %v231_v7 }
  0x16   : > { %v208_v21 = vadd.f32 %v207_v15, %v206_v9  ;;  %v227_v24 = vrot.slane %v226_v18, 2 }
  0x17   : > { %v200_v20 = vadd.f32 %v199_v14, %v198_v8  ;;  %v214_v22 = vadd.f32 %v213_v16, %v212_v10  ;;  %v220_v23 = vrot.slane %v219_v17, 2  ;;  %v234_v25 = vrot.slane %v233_v19, 2 }
  0x18   : > { %v209_v27 = vrot.slane %v208_v21, 1  ;;  %v228_v30 = vadd.f32 %v227_v24, %v226_v18 }
  0x19   : > { %v201_v26 = vrot.slane %v200_v20, 2  ;;  %v221_v28 = vadd.f32 %v220_v23, %v219_v17  ;;  %v215_v29 = vrot.slane %v214_v22, 1  ;;  %v235_v31 = vadd.f32 %v234_v25, %v233_v19 }
  0x1a   : > { %v229_v34 = vrot.slane %v228_v30, 1  ;;  %v210_v36 = vadd.f32 %v209_v27, %v208_v21 }
  0x1b   : > { %v202_v32 = vadd.f32 %v201_v26, %v200_v20  ;;  %v222_v33 = vrot.slane %v221_v28, 1  ;;  %v236_v37 = vrot.slane %v235_v31, 1  ;;  %v216_v38 = vadd.f32 %v215_v29, %v214_v22 }
  0x1c   : > { %v230_v41 = vadd.f32 %v229_v34, %v228_v30 }
  0x1d   : > { %v203_v35 = vrot.slane %v202_v32, 1  ;;  %v223_v40 = vadd.f32 %v222_v33, %v221_v28  ;;  %v237_v42 = vadd.f32 %v236_v37, %v235_v31 }
  0x1f   : > { %v204_v39 = vadd.f32 %v203_v35, %v202_v32 }
  0x21   : > { %v239_v43 = vsel %vm238_vm0, %v204_v39, %v210_v36 }
  0x22   : > { %v241_v44 = vsel %vm240_vm1, %v239_v43, %v216_v38 }
  0x23   : > { %v243_v45 = vsel %vm242_vm2, %v241_v44, %v223_v40 }
  0x24   : > { %v245_v46 = vsel %vm244_vm3, %v243_v45, %v230_v41 }
  0x25   : > { %v247_v47 = vsel %vm246_vm4, %v245_v46, %v237_v42 }
  0x26   : > { %v249_v48 = vsel %vm248_vm5, %v247_v47, 0.0 }
  0x27   : > { %252 = vst [vmem:[%s189_s22] sm:$0xff] %v249_v48 }
  0x28 PF: > { %s12_s11 = sadd.s32 1, %s389_s11   ;;  %s450_s9 = smov %s385_s10 }
  0x29   : > { %p9_p5 = scmp.ge.s32.totalorder %s12_s11, 4   ;;  %s451_s10 = smov %s453_s12 }
  0x2b   :  { %11 = sbr.rel (!%p9_p5) target bundleno = 2 (0x2), region = 65 }

</bundles_post_ra>
